<compile_context>
chip_gen: v5e
topology: v5e:2x2
jax: 0.10.0
libtpu: 0.0.40
codegen_flags: <defaults>
</compile_context>

<pallas_src>
import functools
import math

import jax
import jax.numpy as jnp
from jax.experimental import pallas as pl
from jax.experimental.pallas import tpu as pltpu


def _rotary_kernel(inv_freq_ref, bias_ref, out_ref, *, k, rows_per_block):
    # inv_freq_ref: VMEM (1, lanes) f32   inv_freq_full[lane % dim]
    # bias_ref:     VMEM (1, lanes) f32   (lane // dim + offset) * inv_freq_row
    # out_ref:      VMEM (rows_per_block, lanes) f32 output slab tile
    i = pl.program_id(0)
    rows, lanes = out_ref.shape

    # Only the axis-0 iota is needed; every lane-dependent term lives in the
    # two precomputed rows.  Single full-width, unmasked store.
    row = jax.lax.broadcasted_iota(jnp.int32, (rows, lanes), 0)
    pos = i * rows_per_block + row
    if k != 1:                       # static; skip the multiply on the k==1 path
        pos = pos * k
    out_ref[...] = pos.astype(jnp.float32) * inv_freq_ref[...] + bias_ref[...]


def _round_up(x: int, m: int) -> int:
    return -(-x // m) * m


def _choose_rows_per_block(n_rows: int, lanes: int) -> int:
    """~4 MiB f32 row tile, multiple of 8, >= 2 blocks when there is enough
    work (v7x megacore), preferring an exact divisor of n_rows (no tail pad)."""
    if n_rows <= 8:
        return n_rows                                   # block == full array
    target = max(8, ((4 << 20) // (lanes * 4)) // 8 * 8)   # ~4 MiB per tile
    # Leave work for both TensorCores on v7x: at least two blocks.
    target = min(target, max(8, _round_up(pl.cdiv(n_rows, 2), 8)))
    # Largest multiple of 8 in [target/2, target] that divides n_rows exactly.
    lo = max(8, (target // 2) // 8 * 8)
    for cand in range(target, lo - 1, -8):
        if n_rows % cand == 0:
            return cand
    return target                                        # pad the tail instead


def rotary_embedding(max_seq_len: int, inv_freq: jax.Array, offset: int = 0):
    """Returns (1, 1, max_seq_len, dim) float32, matching the PyTorch module."""
    dim_half = inv_freq.shape[0]
    dim = 2 * dim_half

    # emb = cat((freqs, freqs), -1)  ==  (pos + offset) * cat(inv_freq, inv_freq)
    inv_freq_full = jnp.concatenate([inv_freq, inv_freq]).astype(jnp.float32)

    # Lane fold: k consecutive positions share one slab row so the output lane
    # width is always a multiple of 128 (dense stores / dense HBM DMA).
    lanes = math.lcm(dim, 128)
    k = lanes // dim

    # Hoisted lane-dependent terms (computed once, resident across the grid).
    lane = jnp.arange(lanes, dtype=jnp.int32)
    inv_freq_row = jnp.tile(inv_freq_full, k).reshape(1, lanes)        # f[lane % dim]
    lane_bias = (
        (lane // dim + offset).astype(jnp.float32).reshape(1, lanes) * inv_freq_row
    )

    n_rows_logical = pl.cdiv(max_seq_len, k)
    rows_per_block = _choose_rows_per_block(n_rows_logical, lanes)
    grid_n = pl.cdiv(n_rows_logical, rows_per_block)
    n_rows = grid_n * rows_per_block   # pad rows so every block is full & dense

    emb = pl.pallas_call(
        functools.partial(_rotary_kernel, k=k, rows_per_block=rows_per_block),
        out_shape=jax.ShapeDtypeStruct((n_rows, lanes), jnp.float32),
        grid=(grid_n,),
        in_specs=[
            pl.BlockSpec((1, lanes), lambda i: (0, 0)),   # inv_freq row (resident)
            pl.BlockSpec((1, lanes), lambda i: (0, 0)),   # lane bias row (resident)
        ],
        out_specs=pl.BlockSpec((rows_per_block, lanes), lambda i: (i, 0)),
        compiler_params=pltpu.CompilerParams(
            dimension_semantics=("parallel",)
        ),
    )(inv_freq_row, lane_bias)

    # Row-major (n_rows, k*dim) -> (n_rows*k, dim) is a free reshape; slice off
    # any padded tail positions, then 'n d -> 1 1 n d'.
    flat = emb.reshape(n_rows * k, dim)
    if n_rows * k != max_seq_len:
        flat = flat[:max_seq_len]
    return flat.reshape(1, 1, max_seq_len, dim)


def make_inv_freq(dim: int) -> jax.Array:
    # Deterministic "parameter" exactly as in __init__.
    return 1.0 / (10000.0 ** (jnp.arange(0, dim, 2, dtype=jnp.float32) / dim))


def _reference(max_seq_len, inv_freq, offset):
    seq = jnp.arange(max_seq_len, dtype=jnp.float32) + offset
    freqs = jnp.einsum("i,j->ij", seq, inv_freq)
    dim = 2 * inv_freq.shape[0]
    return jnp.concatenate([freqs, freqs], axis=-1).reshape(1, 1, max_seq_len, dim)


def _check(max_seq_len, dim, offset):
    inv_freq = make_inv_freq(dim)
    out = jax.block_until_ready(rotary_embedding(max_seq_len, inv_freq, offset=offset))
    ref = _reference(max_seq_len, inv_freq, offset)
    assert out.shape == (1, 1, max_seq_len, dim), (out.shape, max_seq_len, dim)
    assert jnp.allclose(out, ref, rtol=1e-5, atol=1e-6), (
        f"mismatch vs reference (seq={max_seq_len}, dim={dim}, offset={offset})"
    )


if __name__ == "__main__":
    # PRNGKey kept only for the deterministic-input convention; this module's
    # forward takes no random tensors.
    _ = jax.random.PRNGKey(0)

    # Case 1: small shapes matching the module (dim < 128 -> lane fold k=4).
    _check(max_seq_len=8, dim=32, offset=0)

    # Case 2: nonzero offset folded into the precomputed lane bias (k=2).
    _check(max_seq_len=64, dim=64, offset=3)

    # Case 3: dim=96 does not divide 128 (lcm fold, lanes=384) with an awkward
    # seq length -> exercises multi-block grid + tail-row padding + slice.
    _check(max_seq_len=40, dim=96, offset=5)

    # Case 4: dim >= 128 (k == 1 path), seq split into 2 parallel blocks.
    _check(max_seq_len=512, dim=128, offset=0)

    print("KERNEL_OK")
</pallas_src>

<mosaic_0001>
module attributes {stable_mosaic.version = 11 : i64} {
  func.func @_rotary_kernel(%arg0: i32, %arg1: memref<1x128xf32, #tpu.memory_space<vmem>>, %arg2: memref<1x128xf32, #tpu.memory_space<vmem>>, %arg3: memref<2x128xf32, #tpu.memory_space<vmem>>) attributes {dimension_semantics = [#tpu.dimension_semantics<parallel>], iteration_bounds = array<i64: 1>, scalar_prefetch = 0 : i64, scratch_operands = 0 : i64, tpu.core_type = #tpu.core_type<tc>, window_params = [{pipeline_mode = #tpu.pipeline_mode<synchronous>, transform_indices = @transform_0, window_bounds = array<i64: 1, 128>}, {pipeline_mode = #tpu.pipeline_mode<synchronous>, transform_indices = @transform_1, window_bounds = array<i64: 1, 128>}, {transform_indices = @transform_2, window_bounds = array<i64: 2, 128>}]} {
    %0 = tpu.iota {dimensions = array<i32: 0>} : vector<2x128xi32>
    %c2_i32 = arith.constant 2 : i32
    %1 = arith.muli %arg0, %c2_i32 : i32
    %2 = vector.broadcast %1 : i32 to vector<2x128xi32>
    %3 = arith.addi %2, %0 : vector<2x128xi32>
    %c4_i32 = arith.constant 4 : i32
    %4 = vector.broadcast %c4_i32 : i32 to vector<2x128xi32>
    %5 = arith.muli %3, %4 : vector<2x128xi32>
    %6 = arith.sitofp %5 : vector<2x128xi32> to vector<2x128xf32>
    %c0 = arith.constant 0 : index
    %c0_0 = arith.constant 0 : index
    %7 = vector.load %arg1[%c0, %c0_0] : memref<1x128xf32, #tpu.memory_space<vmem>>, vector<1x128xf32>
    %8 = vector.broadcast %7 : vector<1x128xf32> to vector<2x128xf32>
    %9 = arith.mulf %6, %8 : vector<2x128xf32>
    %c0_1 = arith.constant 0 : index
    %c0_2 = arith.constant 0 : index
    %10 = vector.load %arg2[%c0_1, %c0_2] : memref<1x128xf32, #tpu.memory_space<vmem>>, vector<1x128xf32>
    %11 = vector.broadcast %10 : vector<1x128xf32> to vector<2x128xf32>
    %12 = arith.addf %9, %11 : vector<2x128xf32>
    %c0_3 = arith.constant 0 : index
    %c0_4 = arith.constant 0 : index
    %13 = vector.load %arg3[%c0_3, %c0_4] : memref<2x128xf32, #tpu.memory_space<vmem>>, vector<2x128xf32>
    tpu.vector_store %arg3[%c0_3, %c0_4], %12 {strides = array<i32>} : memref<2x128xf32, #tpu.memory_space<vmem>>, vector<2x128xf32>,
    return
  }
  func.func @transform_0(%arg0: i32) -> (i32, i32) {
    %c0_i32 = arith.constant 0 : i32
    %c0_i32_0 = arith.constant 0 : i32
    %c0_i32_1 = arith.constant 0 : i32
    return %c0_i32, %c0_i32_0 : i32, i32
  }
  func.func @transform_1(%arg0: i32) -> (i32, i32) {
    %c0_i32 = arith.constant 0 : i32
    %c0_i32_0 = arith.constant 0 : i32
    %c0_i32_1 = arith.constant 0 : i32
    return %c0_i32, %c0_i32_0 : i32, i32
  }
  func.func @transform_2(%arg0: i32) -> (i32, i32) {
    %c0_i32 = arith.constant 0 : i32
    %c0_i32_0 = arith.constant 0 : i32
    return %arg0, %c0_i32 : i32, i32
  }
}

</mosaic_0001>

<bundles_post_ra>
// kernel: tpu_custom_call.1
= control target key start
LH: loop header
LB: loop body
LE: loop exit
PB: predicated region body
PF: predicated region fallthrough
CT: control target
= control target key end

     0   :  { %7 = vsyncpa [#allocation3], 0  ;;  %s186_s0 = inlined_call_operand.hbm [shape: f32[1,128], index: 0, kind: input, shape index: {}]   ;;  %s187_s1 = inlined_call_operand.hbm [shape: f32[1,128], index: 1, kind: input, shape index: {}]   ;;  %s188_s2 = inlined_call_operand.hbm [shape: f32[2,128], index: 2, kind: output, shape index: {}]  }
   0x1   :  { %8 = vsyncpa [#allocation6], 0 }
   0x2   :  { %9 = vsyncpa [#allocation4], 0  ;;  %s15_s11 = sshll.u32 %s186_s0, 4  ;;  %s159_s12 = smov [#allocation2]   ;;  %s16_s11 = int_to_ptr.hbm [resolvable:$true] %s15_s11 }
   0x3   :  { %s17_s13 = sshll.u32 %s159_s12, 4  ;;  %s26_s16 = sshll.u32 %s187_s1, 4  ;;  %s18_s13 = int_to_ptr.vmem [resolvable:$true] %s17_s13  ;;  %s27_s16 = int_to_ptr.hbm [resolvable:$true] %s26_s16 }
   0x4   :  { %20 = dma.hbm_to_vmem [thread:$0]  %s16_s11, 16, %s18_s13, [#allocation3]  }
   0x5   :  { %s160_s17 = smov [#allocation5]  }
   0x6   :  { %s28_s18 = sshll.u32 %s160_s17, 4  ;;  %s29_s18 = int_to_ptr.vmem [resolvable:$true] %s28_s18 }
   0x7   :  { %31 = dma.hbm_to_vmem [thread:$0]  %s27_s16, 16, %s29_s18, [#allocation6]  }
   0x8   :  { %153 = dma.done.wait [#allocation3], 16  }
   0x9   :  { %154 = vsyncadd [#allocation3], 4294967280 }
   0xa   :  { %155 = dma.done.wait [#allocation6], 16  }
   0xb   :  { %156 = vsyncadd [#allocation6], 4294967280  ;;  %v40_v0 = vlaneseq  ;;  %v79_v4 = vld [vmem:[#allocation2] ss:$0 sm:$0xff]  ;;  %v80_v5 = vld [vmem:[#allocation5] ss:$0 sm:$0xff] }
   0xc   :  { %s161_s0 = smov [#allocation7]   ;;  %s65_s21 = sshll.u32 %s188_s2, 4  ;;  %s66_s21 = int_to_ptr.hbm [resolvable:$true] %s65_s21 }
   0xd   :  { %v41_v1 = vshrl.u32 %v40_v0, 7  ;;  %s63_s19 = sshll.u32 %s161_s0, 4  ;;  %s64_s19 = int_to_ptr.vmem [resolvable:$true] %s63_s19 }
   0xf   :  { %v45_v2 = vmul.u32 4, %v41_v1 }
  0x11   :  { %v46_v3 = vcvt.s32.f32 %v45_v2 }
  0x13   :  { %v51_v6 = vmul.f32 %v79_v4, %v46_v3 }
  0x15   :  { %v56_v7 = vadd.f32 %v80_v5, %v51_v6 }
  0x17   :  { %57 = vst [vmem:[#allocation7] sm:$0x3] %v56_v7 }
  0x18   :  { %68 = dma.vmem_to_hbm [thread:$0]  %s64_s19, 32, %s66_s21, [#allocation4]  }
  0x19   :  { %157 = dma.done.wait [#allocation4], 32  }
  0x1a   :  { %158 = vsyncadd [#allocation4], 4294967264 }
  0x1b   :  { %73 = vsyncpa [#allocation3], 1 }
  0x1c   :  { %74 = vsyncpa [#allocation6], 1 }
  0x1d   :  { %75 = vsyncpa [#allocation4], 1 }

</bundles_post_ra>
